<compile_context>
chip_gen: v7x
topology: tpu7x:2x2x1
jax: 0.10.0
libtpu: 0.0.40
codegen_flags: <defaults>
</compile_context>

<pallas_src>
import functools

import jax
import jax.numpy as jnp
from jax import lax
from jax.experimental import pallas as pl
from jax.experimental.pallas import tpu as pltpu


# ---------------------------------------------------------------------------
# Fused kernel: projections -> attention (softmax dim=1) -> conv_mask + residual
# ---------------------------------------------------------------------------
def _nonlocal_block_kernel(w_all_ref, w_mask_ref, x_ref, o_ref, *, n_tiles, mxu_dtype):
    """Per-batch fused NonLocalBlock (batch dim squeezed by the BlockSpecs).

    w_all_ref : (3*c2, c)  stacked [w_phi; w_theta; w_g], already in MXU dtype
    w_mask_ref: (c, c2)    conv_mask weight, already in MXU dtype
    x_ref     : (c, hw)    input feature map (channels-major)
    o_ref     : (c, hw)    output
    """
    c, hw = x_ref.shape
    c2 = w_mask_ref.shape[1]
    n = hw // 2                       # N of the (b, c, N) re-view quirk
    tj = n // n_tiles
    dot_dt = x_ref.dtype if mxu_dtype is None else mxu_dtype

    x = x_ref[...]                                   # (c, hw), input dtype
    x_d = x.astype(dot_dt)

    # Fused 1x1 projections: one MXU matmul produces phi/theta/g.
    proj = jnp.dot(w_all_ref[...], x_d,
                   preferred_element_type=jnp.float32)            # (3*c2, hw) f32
    pb = proj.astype(dot_dt)

    # `.view(b, c, -1)` quirk: the (c2, hw) conv output re-viewed as (c, N)
    # has row 2r+t equal to lane-half t of row r.  The channel contraction is
    # row-order invariant, so we use ordering [all half-0 rows ; all half-1
    # rows] (one sublane concat) -- this also makes the epilogue's even/odd
    # split two contiguous sublane slices.
    def as_view(a):                                   # (c2, hw) -> (c, n)
        return jnp.concatenate([a[:, :n], a[:, n:]], axis=0)

    phi_s = as_view(pb[:c2])
    th_s = as_view(pb[c2:2 * c2])
    g_s = as_view(pb[2 * c2:])

    # Attention.  PyTorch softmax(dim=1) on s (N, N) == row-wise softmax of
    # s^T, so each j-tile of s^T rows carries its complete softmax axis and the
    # full (N, N) matrix never has to be resident.
    cdims = (((0,), (0,)), ((), ()))      # contract the channel (sublane) axis
    o_acc = None                          # (c, n) f32, o^T rows in [even; odd] order
    for t in range(n_tiles):              # static trip count (unrolled)
        j0 = t * tj
        sT = lax.dot_general(phi_s[:, j0:j0 + tj], th_s, cdims,
                             preferred_element_type=jnp.float32)      # (tj, n)
        sT = sT - jnp.max(sT, axis=-1, keepdims=True)
        sT = jnp.exp(sT)
        pT = sT * pl.reciprocal(jnp.sum(sT, axis=-1, keepdims=True), approx=True)
        contrib = jnp.dot(g_s[:, j0:j0 + tj], pT.astype(dot_dt),
                          preferred_element_type=jnp.float32)         # (c, n)
        o_acc = contrib if o_acc is None else o_acc + contrib

    # conv_mask + residual, written straight into the two output lane halves
    # (the reference's y (c2, hw) has y[:, :n] = even view rows, y[:, n:] = odd
    # view rows, so no concat / y buffer is needed).
    w_mask = w_mask_ref[...]
    x_f32 = x.astype(jnp.float32)
    out0 = jnp.dot(w_mask, o_acc[:c2].astype(dot_dt),
                   preferred_element_type=jnp.float32) + x_f32[:, :n]
    out1 = jnp.dot(w_mask, o_acc[c2:].astype(dot_dt),
                   preferred_element_type=jnp.float32) + x_f32[:, n:]
    o_ref[:, :n] = out0.astype(o_ref.dtype)
    o_ref[:, n:] = out1.astype(o_ref.dtype)


# ---------------------------------------------------------------------------
# Wrapper
# ---------------------------------------------------------------------------
def non_local_block(x, w_phi, w_theta, w_g, w_mask, *,
                    mxu_dtype=jnp.bfloat16, score_block=512):
    """x: (b, c, h, w) NCHW.  w_phi/w_theta/w_g: (c//2, c); w_mask: (c, c//2).

    mxu_dtype: dtype of the MXU operands (default bf16; accumulation, softmax
    and the residual stay in f32).  mxu_dtype=None keeps operands in x.dtype.
    score_block: rows of s^T processed per tile; bounds the resident score /
    probability tile to (score_block, h*w/2).
    """
    b, c, h, w = x.shape
    assert c % 2 == 0, "NonLocalBlock needs an even channel count (inter_channel = c // 2)"
    c2 = c // 2
    hw = h * w
    assert hw % 2 == 0, "the .view(b, c, -1) quirk requires h*w to be even"
    n = hw // 2
    # Best MXU/lane utilization when n % 128 == 0 and c2 is a multiple of the
    # MXU tile (128 on v5e, 256 on v6e/v7x); other sizes are correct but pay
    # masked stores / relayouts.

    wdt = x.dtype if mxu_dtype is None else mxu_dtype
    w_all = jnp.concatenate([w_phi, w_theta, w_g], axis=0).astype(wdt)   # (3*c2, c)
    w_mask_c = w_mask.astype(wdt)                                        # (c, c2)
    x_flat = x.reshape(b, c, hw)

    # j-tiling of the score rows (falls back to one tile if it does not divide n).
    if score_block is not None and n > score_block and n % score_block == 0:
        tj = score_block
    else:
        tj = n
    n_tiles = n // tj

    kernel = functools.partial(_nonlocal_block_kernel,
                               n_tiles=n_tiles, mxu_dtype=mxu_dtype)

    # Per-grid-step VMEM working set -> explicit scoped-VMEM budget.
    in_bytes = x.dtype.itemsize
    w_bytes = jnp.dtype(wdt).itemsize
    ws = (2 * 2 * c * hw * in_bytes                 # x + out blocks, double buffered
          + 2 * (3 * c2 * c + c * c2) * w_bytes     # weights (double buffered)
          + 3 * c2 * hw * 4                         # fused projection output (f32)
          + 3 * c * n * w_bytes                     # stacked MXU operands
          + c * n * 4                               # o^T accumulator (f32)
          + tj * n * (4 + w_bytes)                  # score tile (f32) + probabilities
          + 2 * c * hw * 4)                         # epilogue / relayout slack
    try:
        phys_vmem = int(pltpu.get_tpu_info().vmem_capacity_bytes)
    except Exception:
        phys_vmem = 64 * 1024 * 1024
    vmem_limit = int(min(max(int(1.5 * ws), 32 * 1024 * 1024), phys_vmem * 3 // 4))

    # Advisory cost estimate so XLA schedules around the custom call sensibly.
    flops = b * (2 * (3 * c2) * c * hw      # fused projections
                 + 2 * c * n * n            # theta^T . phi (full channel depth)
                 + 2 * c * n * n            # softmax @ g
                 + 2 * c * c2 * hw)         # conv_mask
    bytes_accessed = (2 * b * c * hw * in_bytes
                      + (3 * c2 * c + c * c2) * w_bytes)
    cost = pl.CostEstimate(flops=flops, transcendentals=b * n * n,
                           bytes_accessed=bytes_accessed)

    out = pl.pallas_call(
        kernel,
        out_shape=jax.ShapeDtypeStruct((b, c, hw), x.dtype),
        grid=(b,),
        in_specs=[
            pl.BlockSpec((3 * c2, c), lambda i: (0, 0)),        # stacked [phi;theta;g]
            pl.BlockSpec((c, c2), lambda i: (0, 0)),            # w_mask
            pl.BlockSpec((None, c, hw), lambda i: (i, 0, 0)),   # x (batch squeezed)
        ],
        out_specs=pl.BlockSpec((None, c, hw), lambda i: (i, 0, 0)),
        compiler_params=pltpu.CompilerParams(
            # batch axis is embarrassingly parallel -> v7x megacore shards it
            dimension_semantics=("parallel",),
            vmem_limit_bytes=vmem_limit,
        ),
        cost_estimate=cost,
    )(w_all, w_mask_c, x_flat)
    return out.reshape(b, c, h, w)


# ---------------------------------------------------------------------------
# Pure-JAX reference (sanity check only)
# ---------------------------------------------------------------------------
def non_local_block_ref(x, w_phi, w_theta, w_g, w_mask):
    b, c, h, w = x.shape
    c2 = c // 2
    hw = h * w
    xf = x.reshape(b, c, hw)
    phi = jnp.einsum("oi,bip->bop", w_phi, xf).reshape(b, c, -1)
    theta = jnp.einsum("oi,bip->bop", w_theta, xf).reshape(b, c, -1).transpose(0, 2, 1)
    g = jnp.einsum("oi,bip->bop", w_g, xf).reshape(b, c, -1).transpose(0, 2, 1)
    s = jnp.matmul(theta, phi)
    p = jax.nn.softmax(s, axis=1)          # PyTorch softmax(dim=1)
    o = jnp.matmul(p, g)
    y = o.transpose(0, 2, 1).reshape(b, c2, hw)
    mask = jnp.einsum("oi,bip->bop", w_mask, y)
    return (mask + xf).reshape(b, c, h, w)


if __name__ == "__main__":
    # Small deterministic example: batch=2, channels=4, spatial=16x16
    b, c, h, w = 2, 4, 16, 16
    c2 = c // 2

    key = jax.random.PRNGKey(0)
    kx, kphi, ktheta, kg, kmask = jax.random.split(key, 5)

    x = jax.random.normal(kx, (b, c, h, w), dtype=jnp.float32)
    # 1x1 conv weights (out, in, 1, 1) in PyTorch -> stored here as (out, in);
    # the module uses bias=False everywhere, so there is no bias term.
    w_phi = jax.random.normal(kphi, (c2, c), dtype=jnp.float32) * 0.1
    w_theta = jax.random.normal(ktheta, (c2, c), dtype=jnp.float32) * 0.1
    w_g = jax.random.normal(kg, (c2, c), dtype=jnp.float32) * 0.1
    w_mask = jax.random.normal(kmask, (c, c2), dtype=jnp.float32) * 0.1

    ref = non_local_block_ref(x, w_phi, w_theta, w_g, w_mask)

    # Default path: bf16 MXU operands, f32 accumulation / softmax / residual.
    out = jax.block_until_ready(non_local_block(x, w_phi, w_theta, w_g, w_mask))
    assert out.shape == (b, c, h, w)
    assert jnp.allclose(out, ref, atol=5e-2, rtol=5e-2)

    # f32-operand path (tighter tolerance; softmax still uses approx reciprocal).
    out_f32 = jax.block_until_ready(
        non_local_block(x, w_phi, w_theta, w_g, w_mask, mxu_dtype=None))
    assert jnp.allclose(out_f32, ref, atol=5e-3, rtol=5e-3)

    # Force the score-row tiling path (n=128 -> 4 j-tiles of 32) to exercise it.
    out_tiled = jax.block_until_ready(
        non_local_block(x, w_phi, w_theta, w_g, w_mask, score_block=32))
    assert jnp.allclose(out_tiled, ref, atol=5e-2, rtol=5e-2)

    print("KERNEL_OK")
</pallas_src>

<mosaic_0001>
module attributes {stable_mosaic.version = 11 : i64} {
  func.func @_nonlocal_block_kernel(%arg0: i32, %arg1: memref<6x4xbf16, #tpu.memory_space<vmem>>, %arg2: memref<4x2xbf16, #tpu.memory_space<vmem>>, %arg3: memref<1x4x256xf32, #tpu.memory_space<vmem>>, %arg4: memref<1x4x256xf32, #tpu.memory_space<vmem>>) attributes {dimension_semantics = [#tpu.dimension_semantics<parallel>], iteration_bounds = array<i64: 2>, scalar_prefetch = 0 : i64, scratch_operands = 0 : i64, tpu.core_type = #tpu.core_type<tc>, window_params = [{pipeline_mode = #tpu.pipeline_mode<synchronous>, transform_indices = @transform_0, window_bounds = array<i64: 6, 4>}, {pipeline_mode = #tpu.pipeline_mode<synchronous>, transform_indices = @transform_1, window_bounds = array<i64: 4, 2>}, {transform_indices = @transform_2, window_bounds = array<i64: 1, 4, 256>}, {transform_indices = @transform_3, window_bounds = array<i64: 1, 4, 256>}]} {
    %c0 = arith.constant 0 : index
    %c0_0 = arith.constant 0 : index
    %c0_1 = arith.constant 0 : index
    %0 = vector.load %arg3[%c0, %c0_0, %c0_1] : memref<1x4x256xf32, #tpu.memory_space<vmem>>, vector<1x4x256xf32>
    %1 = vector.shape_cast %0 : vector<1x4x256xf32> to vector<4x256xf32>
    %2 = arith.truncf %1 : vector<4x256xf32> to vector<4x256xbf16>
    %c0_2 = arith.constant 0 : index
    %c0_3 = arith.constant 0 : index
    %3 = vector.load %arg1[%c0_2, %c0_3] : memref<6x4xbf16, #tpu.memory_space<vmem>>, vector<6x4xbf16>
    %cst = arith.constant dense<0.000000e+00> : vector<6x256xf32>
    %4 = tpu.matmul %3, %2, %cst {dimension_numbers = #tpu.dot_dimension_numbers<[1], [0], [0], [1], [0, 0, 1, 1], [], []>} : vector<6x4xbf16>, vector<4x256xbf16>, vector<6x256xf32> -> vector<6x256xf32>
    %5 = arith.truncf %4 : vector<6x256xf32> to vector<6x256xbf16>
    %6 = vector.extract_strided_slice %5 {offsets = [0, 0], sizes = [2, 256], strides = [1, 1]} : vector<6x256xbf16> to vector<2x256xbf16>
    %7 = vector.extract_strided_slice %6 {offsets = [0, 0], sizes = [2, 128], strides = [1, 1]} : vector<2x256xbf16> to vector<2x128xbf16>
    %8 = vector.extract_strided_slice %6 {offsets = [0, 128], sizes = [2, 128], strides = [1, 1]} : vector<2x256xbf16> to vector<2x128xbf16>
    %9 = tpu.concatenate %7, %8 in 0 : vector<2x128xbf16>, vector<2x128xbf16> -> vector<4x128xbf16>
    %10 = vector.extract_strided_slice %5 {offsets = [2, 0], sizes = [2, 256], strides = [1, 1]} : vector<6x256xbf16> to vector<2x256xbf16>
    %11 = vector.extract_strided_slice %10 {offsets = [0, 0], sizes = [2, 128], strides = [1, 1]} : vector<2x256xbf16> to vector<2x128xbf16>
    %12 = vector.extract_strided_slice %10 {offsets = [0, 128], sizes = [2, 128], strides = [1, 1]} : vector<2x256xbf16> to vector<2x128xbf16>
    %13 = tpu.concatenate %11, %12 in 0 : vector<2x128xbf16>, vector<2x128xbf16> -> vector<4x128xbf16>
    %14 = vector.extract_strided_slice %5 {offsets = [4, 0], sizes = [2, 256], strides = [1, 1]} : vector<6x256xbf16> to vector<2x256xbf16>
    %15 = vector.extract_strided_slice %14 {offsets = [0, 0], sizes = [2, 128], strides = [1, 1]} : vector<2x256xbf16> to vector<2x128xbf16>
    %16 = vector.extract_strided_slice %14 {offsets = [0, 128], sizes = [2, 128], strides = [1, 1]} : vector<2x256xbf16> to vector<2x128xbf16>
    %17 = tpu.concatenate %15, %16 in 0 : vector<2x128xbf16>, vector<2x128xbf16> -> vector<4x128xbf16>
    %cst_4 = arith.constant dense<0.000000e+00> : vector<128x128xf32>
    %18 = tpu.matmul %9, %13, %cst_4 {dimension_numbers = #tpu.dot_dimension_numbers<[0], [0], [1], [1], [0, 1, 1, 1], [], []>} : vector<4x128xbf16>, vector<4x128xbf16>, vector<128x128xf32> -> vector<128x128xf32>
    %cst_5 = arith.constant dense<0xFF800000> : vector<128xf32>
    %19 = vector.multi_reduction <maximumf>, %18, %cst_5 [1] : vector<128x128xf32> to vector<128xf32>
    %20 = vector.shape_cast %19 : vector<128xf32> to vector<128x1xf32>
    %21 = vector.broadcast %20 : vector<128x1xf32> to vector<128x128xf32>
    %22 = arith.subf %18, %21 : vector<128x128xf32>
    %23 = math.exp %22 : vector<128x128xf32>
    %cst_6 = arith.constant dense<0.000000e+00> : vector<128xf32>
    %24 = vector.multi_reduction <add>, %23, %cst_6 [1] : vector<128x128xf32> to vector<128xf32>
    %25 = vector.shape_cast %24 : vector<128xf32> to vector<128x1xf32>
    %26 = tpu.reciprocal %25 {approx = true} : vector<128x1xf32> -> vector<128x1xf32>
    %27 = vector.broadcast %26 : vector<128x1xf32> to vector<128x128xf32>
    %28 = arith.mulf %23, %27 : vector<128x128xf32>
    %29 = arith.truncf %28 : vector<128x128xf32> to vector<128x128xbf16>
    %cst_7 = arith.constant dense<0.000000e+00> : vector<4x128xf32>
    %30 = tpu.matmul %17, %29, %cst_7 {dimension_numbers = #tpu.dot_dimension_numbers<[1], [0], [0], [1], [0, 0, 1, 1], [], []>} : vector<4x128xbf16>, vector<128x128xbf16>, vector<4x128xf32> -> vector<4x128xf32>
    %c0_8 = arith.constant 0 : index
    %c0_9 = arith.constant 0 : index
    %31 = vector.load %arg2[%c0_8, %c0_9] : memref<4x2xbf16, #tpu.memory_space<vmem>>, vector<4x2xbf16>
    %32 = vector.extract_strided_slice %30 {offsets = [0, 0], sizes = [2, 128], strides = [1, 1]} : vector<4x128xf32> to vector<2x128xf32>
    %33 = arith.truncf %32 : vector<2x128xf32> to vector<2x128xbf16>
    %cst_10 = arith.constant dense<0.000000e+00> : vector<4x128xf32>
    %34 = tpu.matmul %31, %33, %cst_10 {dimension_numbers = #tpu.dot_dimension_numbers<[1], [0], [0], [1], [0, 0, 1, 1], [], []>} : vector<4x2xbf16>, vector<2x128xbf16>, vector<4x128xf32> -> vector<4x128xf32>
    %35 = vector.extract_strided_slice %1 {offsets = [0, 0], sizes = [4, 128], strides = [1, 1]} : vector<4x256xf32> to vector<4x128xf32>
    %36 = arith.addf %34, %35 : vector<4x128xf32>
    %37 = vector.extract_strided_slice %30 {offsets = [2, 0], sizes = [2, 128], strides = [1, 1]} : vector<4x128xf32> to vector<2x128xf32>
    %38 = arith.truncf %37 : vector<2x128xf32> to vector<2x128xbf16>
    %cst_11 = arith.constant dense<0.000000e+00> : vector<4x128xf32>
    %39 = tpu.matmul %31, %38, %cst_11 {dimension_numbers = #tpu.dot_dimension_numbers<[1], [0], [0], [1], [0, 0, 1, 1], [], []>} : vector<4x2xbf16>, vector<2x128xbf16>, vector<4x128xf32> -> vector<4x128xf32>
    %40 = vector.extract_strided_slice %1 {offsets = [0, 128], sizes = [4, 128], strides = [1, 1]} : vector<4x256xf32> to vector<4x128xf32>
    %41 = arith.addf %39, %40 : vector<4x128xf32>
    %c0_12 = arith.constant 0 : index
    %c0_13 = arith.constant 0 : index
    %c0_14 = arith.constant 0 : index
    %42 = vector.load %arg4[%c0_12, %c0_13, %c0_14] : memref<1x4x256xf32, #tpu.memory_space<vmem>>, vector<1x4x128xf32>
    %43 = vector.shape_cast %42 : vector<1x4x128xf32> to vector<4x128xf32>
    %44 = vector.shape_cast %36 : vector<4x128xf32> to vector<1x4x128xf32>
    tpu.vector_store %arg4[%c0_12, %c0_13, %c0_14], %44 {strides = array<i32>} : memref<1x4x256xf32, #tpu.memory_space<vmem>>, vector<1x4x128xf32>,
    %c0_15 = arith.constant 0 : index
    %c0_16 = arith.constant 0 : index
    %c128 = arith.constant 128 : index
    %45 = vector.load %arg4[%c0_15, %c0_16, %c128] : memref<1x4x256xf32, #tpu.memory_space<vmem>>, vector<1x4x128xf32>
    %46 = vector.shape_cast %45 : vector<1x4x128xf32> to vector<4x128xf32>
    %47 = vector.shape_cast %41 : vector<4x128xf32> to vector<1x4x128xf32>
    tpu.vector_store %arg4[%c0_15, %c0_16, %c128], %47 {strides = array<i32>} : memref<1x4x256xf32, #tpu.memory_space<vmem>>, vector<1x4x128xf32>,
    return
  }
  func.func @transform_0(%arg0: i32) -> (i32, i32) {
    %c0_i32 = arith.constant 0 : i32
    %c0_i32_0 = arith.constant 0 : i32
    %c0_i32_1 = arith.constant 0 : i32
    return %c0_i32, %c0_i32_0 : i32, i32
  }
  func.func @transform_1(%arg0: i32) -> (i32, i32) {
    %c0_i32 = arith.constant 0 : i32
    %c0_i32_0 = arith.constant 0 : i32
    %c0_i32_1 = arith.constant 0 : i32
    return %c0_i32, %c0_i32_0 : i32, i32
  }
  func.func @transform_2(%arg0: i32) -> (i32, i32, i32) {
    %c0_i32 = arith.constant 0 : i32
    %c0_i32_0 = arith.constant 0 : i32
    %c0_i32_1 = arith.constant 0 : i32
    return %arg0, %c0_i32, %c0_i32_0 : i32, i32, i32
  }
  func.func @transform_3(%arg0: i32) -> (i32, i32, i32) {
    %c0_i32 = arith.constant 0 : i32
    %c0_i32_0 = arith.constant 0 : i32
    %c0_i32_1 = arith.constant 0 : i32
    return %arg0, %c0_i32, %c0_i32_0 : i32, i32, i32
  }
}

</mosaic_0001>

<bundles_post_ra>
// kernel: tpu_custom_call.1
= control target key start
LH: loop header
LB: loop body
LE: loop exit
PB: predicated region body
PF: predicated region fallthrough
CT: control target
= control target key end

     0   :  { %8 = vsyncpa [#allocation3], 0  ;;  %s1433_s0 = inlined_call_operand.vmem [shape: bf16[6,4], index: 0, kind: input, shape index: {}]   ;;  %s1434_s1 = inlined_call_operand.vmem [shape: bf16[4,2], index: 1, kind: input, shape index: {}]   ;;  %s1435_s2 = inlined_call_operand.hbm [shape: f32[2,4,256], index: 2, kind: input, shape index: {}]   ;;  %s1436_s3 = inlined_call_operand.hbm [shape: f32[2,4,256], index: 3, kind: output, shape index: {}]  }
   0x1   :  { %10 = vsyncpa [#allocation3 + $0x1], 0 }
   0x2   :  { %11 = vsyncpa [#allocation4], 0 }
   0x3   :  { %13 = vsyncpa [#allocation4 + $0x1], 0  ;;  %s1117_s12 = smov 0   ;;  %s1119_s13 = smov 0  }
   0x4   :  { %s1121_s14 = smov 0   ;;  %s1123_s15 = smov 0  }
   0x5 LB: > { %s1138_s16 = sadd.s32 4294967295, %s1090_s15   ;;  %s779_s17 = sadd.s32 4294967294, %s1090_s15   ;;  %s1090_s15 = sphi %s1123_s15, %s1451_s15   ;;  %s1086_s14 = sphi %s1121_s14, %s1450_s14   ;;  %s1082_s13 = sphi %s1119_s13, %s1449_s13   ;;  %s1078_s12 = sphi %s1117_s12, %s1448_s12  }
   0x6   : > { %s1142_s18 = sadd.s32 1, %s1090_s15   ;;  %s68_s19 = sadd.s32 1, %s1086_s14 }
   0x7   : > { %s65_s20 = ssub.s32 %s1090_s15, %s1142_s18  ;;  %p75_p0 = scmp.ne.s32.totalorder %s1086_s14, %s1082_s13 }
   0x8   : > { %p66_p1 = scmp.eq.s32.totalorder %s65_s20, 0  ;;  %p76_p2 = scmp.eq.s32.totalorder %s1090_s15, 0 }
   0x9   : > { %p81_p3 = scmp.ne.s32.totalorder %s1082_s13, %s1078_s12  ;;  %p82_p4 = scmp.eq.s32.totalorder %s1138_s16, 0 }
   0xa   : > { %s1154_s21 = scalar_select %p66_p1, %s1086_s14, %s68_s19  }
   0xb   : > { %p1156_p5 = por %p76_p2, %p75_p0  ;;  %p1160_p6 = por %p82_p4, %p81_p3 }
   0xc   : > { %p105_p7 = scmp.eq.s32.totalorder %s1138_s16, 1  ;;  %p111_p8 = scmp.eq.s32.totalorder %s779_s17, 1 }
   0xd   : > { %p892_p10 = scmp.lt.s32.totalorder %s1090_s15, 2  ;;  %s137_s26 = sand.u32 1, %s1086_s14  }
   0xe   : > { %p1167_p11 = por %p105_p7, %p75_p0  ;;  %p1171_p12 = por %p111_p8, %p81_p3 }
   0xf   : > { %s805_s27 = sshll.u32 %s1090_s15, 7  ;;  %s782_s28 = sshll.u32 %s137_s26, 3 }
  0x10   : > { %s1440_s24 = scalar_select %p1167_p11, 1, 0 }
  0x11   : > { %s1441_s25 = scalar_select %p1171_p12, 1, 0 }
  0x12   : > { %s1180_s4 = scalar_lea.hbm %s1435_s2, %s805_s27  ;;  %s141_s5 = scalar_lea.vmem [#allocation2], %s782_s28 }
  0x13   : > { %s149_s6 = sshll.u32 %s141_s5, 4  ;;  %p1184_p13 = pnand %p892_p10, %p1156_p5  ;;  %s1188_s6 = int_to_ptr.vmem [resolvable:$true] %s149_s6 }
  0x14   : > { %s138_s8 = scalar_lea.sflag [#allocation3], %s137_s26  ;;  %s994_s9 = scalar_lea.hbm %s1180_s4, 128 }
  0x15   : > { %p995_p2 = scmp.ne.s32.totalorder %s1180_s4, %s994_s9  ;;  %p996_p3 = pneg %p1184_p13 }
  0x16   : > { %s999_s17 = scalar_lea.hbm %s1435_s2, 256  ;;  %p1000_p5 = scmp.lt.u32.totalorder %s1180_s4, %s1435_s2 }
  0x17   : > { %p997_p4 = pnand %p996_p3, %p995_p2  ;;  %p1001_p8 = scmp.lt.u32.totalorder %s999_s17, %s994_s9 }
  0x18   : > { %p1003_p9 = scmp.lt.u32.totalorder %s994_s9, %s1180_s4 }
  0x19   : > { %p998_p7 = pneg %p997_p4  ;;  %p1002_p10 = por %p1001_p8, %p1000_p5 }
  0x1b   : > { %p1004_p0 = por %p1003_p9, %p1002_p10 }
  0x1d   : > { %p1005_p1 = pnand %p1004_p0, %p998_p7 }
  0x1f   : > { %1008 = shalt.err (!%p1005_p1)
}
  0x20   : > { %s1009_s22 = scalar_lea.vmem %s1188_s6, 128  ;;  %s1092_s26 = smov [#allocation2]  }
  0x21   : > { %p1010_p2 = scmp.ne.s32.totalorder %s1188_s6, %s1009_s22  ;;  %s1014_s27 = sshll.u32 %s1092_s26, 4  ;;  %s1015_s27 = int_to_ptr.vmem [resolvable:$false] %s1014_s27 }
  0x22   : > { %s1016_s28 = scalar_lea.vmem %s1015_s27, 256  ;;  %p1017_p11 = scmp.lt.s32.totalorder %s1188_s6, %s1015_s27 }
  0x23   : > { %p1012_p4 = pnand %p1010_p2, %p996_p3  ;;  %p1018_p5 = scmp.lt.s32.totalorder %s1016_s28, %s1009_s22 }
  0x25   : > { %p1013_p12 = pneg %p1012_p4  ;;  %p1019_p8 = por %p1018_p5, %p1017_p11 }
  0x27   : > { %p1020_p9 = pnand %p1019_p8, %p1013_p12 }
  0x29   : > { %1023 = shalt.err (!%p1020_p9)
}
  0x2a   : > { %887 = dma.hbm_to_vmem [thread:$0]  (!%p1184_p13), %s1180_s4, 128, %s1188_s6, %s138_s8  }
  0x2b   : > { %p1443_p0 = scmp.lt.s32.totalorder %s1090_s15, 3  ;;  %p1444_p1 = scmp.ge.s32.totalorder %s1090_s15, 1 }
  0x2d   : > { %p155_p3 = pnand %p1444_p1, %p1443_p0 }
  0x2e   : > { %s1222_s29 = sand.u32 (!%p155_p3), 1, %s1082_s13  }
  0x2f   : > { %158 = sbr.rel (%p155_p3) target bundleno = 1415 (0x587), region = 32  ;;  %s786_s30 = sshll.u32 (!%p155_p3), %s1222_s29, 3 }
  0x30   : > { %s161_s5 = scalar_lea.sflag (!%p155_p3), [#allocation3], %s1222_s29  ;;  %s164_s7 = scalar_lea.vmem (!%p155_p3), [#allocation2], %s786_s30 }
  0x36   : > { %1069 = dma.done.wait (%p1160_p6), %s161_s5, 128  }
  0x37   : > { %1071 = vsyncadd (%p1160_p6), %s161_s5, 4294967168  ;;  %v1093_v0 = vmov 0   ;;  %v1232_v1 = vld [vmem:[%s164_s7] sm:$0xff]  ;;  %vm199_vm0 = vcmask 1041408   ;;  %vm195_vm1 = vcmask 31744   ;;  %vm251_vm2 = vcmask 1040384  }
  0x38   : > { %238 = vmatprep.mubr.bf16.mxu0 %v1093_v0  ;;  %v1236_v2 = vcombine.high %v1232_v1, %v1232_v1  ;;  %v192_v3 = vpack.c.bf16 %v1232_v1, %v1232_v1  ;;  %v194_v6 = vld [vmem:[%s1433_s0] sm:$0x7]  ;;  %vm1095_vm3 = vmmov 0   ;;  %vm600_vm4 = vcmask 15360   ;;  %s806_s9 = sshll.u32 %s1138_s16, 7  ;;  %s186_s10 = scalar_lea.vmem [#allocation5], %s786_s30 }
  0x39   : > { %s709_s11 = sshll.u32 %s186_s10, 4  ;;  %s1389_s20 = scalar_lea.hbm %s1436_s3, %s806_s9  ;;  %s1391_s11 = int_to_ptr.vmem [resolvable:$true] %s709_s11 }
  0x3a   : > { %v193_v4 = vpack.c.bf16 %v1236_v2, %v1236_v2  ;;  %v201_v5 = vsel %vm199_vm0, %v192_v3, 0  ;;  %s695_s16 = scalar_lea.sflag [#allocation4], %s1222_s29  ;;  %s1024_s22 = scalar_lea.vmem %s1391_s11, 128 }
  0x3b   : > { %p1025_p6 = scmp.ne.s32.totalorder %s1391_s11, %s1024_s22  ;;  %p1445_p11 = scmp.ne.s32.totalorder %s1440_s24, 0 }
  0x3c   : > { %788 = vmatprep.subr.msk.bf16.mxu0 %vm199_vm0, %v193_v4  ;;  %s1096_s26 = smov [#allocation5]  }
  0x3d   : > { %207 = vmatpush1.bf16.msra.mxu0 %v201_v5  ;;  %p1026_p12 = pnand %p1025_p6, %p1445_p11  ;;  %s1028_s27 = sshll.u32 %s1096_s26, 4  ;;  %s1029_s27 = int_to_ptr.vmem [resolvable:$false] %s1028_s27 }
  0x3e   : > { %s1030_s28 = scalar_lea.vmem %s1029_s27, 256  ;;  %p1031_p7 = scmp.lt.s32.totalorder %s1391_s11, %s1029_s27 }
  0x3f   : > { %p1027_p13 = pneg %p1026_p12  ;;  %p1032_p10 = scmp.lt.s32.totalorder %s1030_s28, %s1024_s22 }
  0x40   : > { %789 = vmatmul.mubr.msk.bf16.vlgmr.msra.gmra.mrb[0].mxu0 %vm195_vm1, %v194_v6 }
  0x41   : > { %p1033_p2 = por %p1032_p10, %p1031_p7 }
  0x43   : > { %p1034_p4 = pnand %p1033_p2, %p1027_p13 }
 0x113   : > { %v240_v7 = vpop.f32.mrb[0].mxu0 }
 0x114   : > { %v247_v8 = vpack.c.bf16 %v240_v7, %v240_v7  ;;  %v242_v9 = vpop.f32.mrb[1].mxu0 }
 0x115   : > { %v248_v10 = vpack.c.bf16 %v242_v9, %v242_v9  ;;  %v244_v11 = vpop.f32.mrb[2].mxu0 }
 0x116   : > { %v261_v12 = vrot.slane %v247_v8, 2  ;;  %v245_v13 = vpop.f32.mrb[3].mxu0  ;;  %v257_v14 = vrot.slane %v247_v8, 1 }
 0x117   : > { %v262_v15 = vrot.slane %v248_v10, 1  ;;  %v250_v16 = vrot.slane %v248_v10, 7 }
 0x118   : > { %v260_v17 = vsel %vm251_vm2, %v257_v14, %v248_v10 }
 0x119   : > { %879 = vmatprep.subr.msk.bf16.mxu1 %vm199_vm0, %v260_v17  ;;  %v307_v18 = vsel %vm199_vm0, %v260_v17, 0  ;;  %v254_v19 = vsel %vm251_vm2, %v247_v8, %v250_v16  ;;  %v1253_v20 = vsel %vm251_vm2, %v261_v12, %v262_v15 }
 0x11a   : > { %830 = vmatpush3.bf16.msra.mxu1 %v307_v18  ;;  %267 = vxpose.xlu0.c.b16.start.end [1/1] (short) %v254_v19, 128 }
 0x180   : > { %v275_v21 = vpop.trf.xlu0 }
 0x181   : > { %831 = vmatprep.mubr.msk.bf16.mxu1 %vm195_vm1, %v275_v21 }
 0x184   : > { %v276_v22 = vpop.trf.xlu0 }
 0x185   : > { %832 = vmatmul.mubr.msk.bf16.vlgmr.msra.gmra.mrb[0].mxu1 %vm195_vm1, %v276_v22 }
 0x188   : > { %v277_v23 = vpop.trf.xlu0 }
 0x189   : > { %835 = vmatprep.mubr.msk.bf16.mxu1 %vm195_vm1, %v277_v23 }
 0x18c   : > { %v278_v24 = vpop.trf.xlu0 }
 0x18d   : > { %836 = vmatmul.mubr.msk.bf16.gmra.mrb[4].mxu1 %vm195_vm1, %v278_v24 }
 0x190   : > { %v279_v25 = vpop.trf.xlu0 }
 0x191   : > { %839 = vmatprep.mubr.msk.bf16.mxu1 %vm195_vm1, %v279_v25 }
 0x194   : > { %v280_v26 = vpop.trf.xlu0 }
 0x195   : > { %840 = vmatmul.mubr.msk.bf16.gmra.mrb[8].mxu1 %vm195_vm1, %v280_v26 }
 0x198   : > { %v281_v27 = vpop.trf.xlu0 }
 0x199   : > { %843 = vmatprep.mubr.msk.bf16.mxu1 %vm195_vm1, %v281_v27 }
 0x19c   : > { %v282_v28 = vpop.trf.xlu0 }
 0x19d   : > { %844 = vmatmul.mubr.msk.bf16.gmra.mrb[12].mxu1 %vm195_vm1, %v282_v28 }
 0x258   : > { %v833_v29 = vpop.f32.mrb[0].mxu1 }
 0x259   : > { %410 = vmax.xlane.f32.xlu1 %v833_v29  ;;  %v343_v30 = vpop.f32.mrb[1].mxu1 }
 0x25a   : > { %406 = vmax.xlane.f32.xlu0 %v343_v30  ;;  %v834_v31 = vpop.f32.mrb[2].mxu1 }
 0x25b   : > { %v346_v32 = vpop.f32.mrb[3].mxu1 }
 0x25d   : > { %412 = vmax.xlane.f32.xlu1 %v834_v31 }
 0x260   : > { %v837_v33 = vpop.f32.mrb[4].mxu1 }
 0x261   : > { %408 = vmax.xlane.f32.xlu1 %v346_v32  ;;  %v359_v34 = vpop.f32.mrb[5].mxu1 }
 0x262   : > { %v838_v35 = vpop.f32.mrb[6].mxu1 }
 0x263   : > { %v362_v36 = vpop.f32.mrb[7].mxu1 }
 0x265   : > { %418 = vmax.xlane.f32.xlu1 %v837_v33 }
 0x268   : > { %v1263_v37 = vpop.f32.mrb[8].mxu1 }
 0x269   : > { %414 = vmax.xlane.f32.xlu1 %v359_v34  ;;  %v1265_v38 = vpop.f32.mrb[9].mxu1 }
 0x26a   : > { %v1267_v39 = vpop.f32.mrb[10].mxu1 }
 0x26b   : > { %v1269_v40 = vpop.f32.mrb[11].mxu1 }
 0x26d   : > { %420 = vmax.xlane.f32.xlu1 %v838_v35 }
 0x270   : > { %v1271_v41 = vpop.f32.mrb[12].mxu1 }
 0x271   : > { %416 = vmax.xlane.f32.xlu1 %v362_v36  ;;  %v1273_v42 = vpop.f32.mrb[13].mxu1 }
 0x272   : > { %v1275_v43 = vpop.f32.mrb[14].mxu1 }
 0x273   : > { %v1277_v44 = vpop.f32.mrb[15].mxu1 }
 0x274   : > { %432 = vmax.xlane.f32.xlu0 %v1277_v44 }
 0x275   : > { %426 = vmax.xlane.f32.xlu1 %v1263_v37 }
 0x278   : > { %436 = vmax.xlane.f32.xlu0 %v1275_v43 }
 0x279   : > { %422 = vmax.xlane.f32.xlu1 %v1265_v38 }
 0x27d   : > { %424 = vmax.xlane.f32.xlu1 %v1269_v40 }
 0x281   : > { %428 = vmax.xlane.f32.xlu1 %v1267_v39 }
 0x285   : > { %430 = vmax.xlane.f32.xlu1 %v1273_v42 }
 0x289   : > { %434 = vmax.xlane.f32.xlu1 %v1271_v41 }
 0x2e6   : > { %v411_v45 = vpop.xlane.xlu1 %410 }
 0x2e7   : > { %v407_v46 = vpop.xlane.xlu0 %406  ;;  %v440_v47 = vsub.f32 %v833_v29, %v411_v45  ;;  %v1094_v45 = vmov 0.0  }
 0x2e8   : > { %v438_v48 = vsub.f32 %v343_v30, %v407_v46  ;;  %847 = vmatprep.subr.bf16.mxu0 %v1094_v45  ;;  %867 = vmatprep.subr.bf16.mxu1 %v1094_v45 }
 0x2e9   : > { %v458_v51 = vmul.f32 1.442695, %v440_v47  ;;  %863 = vmatprep.mubr.msk.bf16.mxu0 %vm1095_vm3, %v1094_v45  ;;  %869 = vmatprep.mubr.msk.bf16.mxu1 %vm1095_vm3, %v1094_v45 }
 0x2ea   : > { %v454_v49 = vmul.f32 1.442695, %v438_v48  ;;  %v413_v50 = vpop.xlane.xlu1 %412 }
 0x2eb   : > { %v441_v53 = vsub.f32 %v834_v31, %v413_v50 }
 0x2ec   : > { %930 = vpow2.f32 %v454_v49 }
 0x2ed   : > { %932 = vpow2.f32 %v458_v51  ;;  %v460_v57 = vmul.f32 1.442695, %v441_v53 }
 0x2ee   : > { %v409_v52 = vpop.xlane.xlu1 %408 }
 0x2ef   : > { %v439_v54 = vsub.f32 %v346_v32, %v409_v52 }
 0x2f1   : > { %v456_v55 = vmul.f32 1.442695, %v439_v54 }
 0x2f2   : > { %v419_v56 = vpop.xlane.xlu1 %418 }
 0x2f3   : > { %934 = vpow2.f32 %v456_v55  ;;  %v444_v60 = vsub.f32 %v837_v33, %v419_v56 }
 0x2f4   : > { %936 = vpow2.f32 %v460_v57 }
 0x2f5   : > { %v466_v3 = vmul.f32 1.442695, %v444_v60 }
 0x2f6   : > { %v1287_v58 = vpop.eup %930  ;;  %v415_v59 = vpop.xlane.xlu1 %414 }
 0x2f7   : > { %v442_v61 = vsub.f32 %v359_v34, %v415_v59  ;;  %486 = vadd.xlane.f32.xlu1 %v1287_v58  ;;  %v1290_v63 = vpop.eup %932 }
 0x2f9   : > { %v462_v62 = vmul.f32 1.442695, %v442_v61 }
 0x2fa   : > { %v421_v0 = vpop.xlane.xlu1 %420 }
 0x2fb   : > { %938 = vpow2.f32 %v462_v62  ;;  %490 = vadd.xlane.f32.xlu1 %v1290_v63  ;;  %v445_v6 = vsub.f32 %v838_v35, %v421_v0 }
 0x2fc   : > { %940 = vpow2.f32 %v466_v3 }
 0x2fd   : > { %v1293_v4 = vpop.eup %934  ;;  %v468_v11 = vmul.f32 1.442695, %v445_v6 }
 0x2fe   : > { %v417_v5 = vpop.xlane.xlu1 %416  ;;  %488 = vadd.xlane.f32.xlu0 %v1293_v4  ;;  %v1296_v8 = vpop.eup %936 }
 0x2ff   : > { %v443_v7 = vsub.f32 %v362_v36, %v417_v5 }
 0x301   : > { %v464_v9 = vmul.f32 1.442695, %v443_v7  ;;  %v433_v17 = vpop.xlane.xlu0 %432 }
 0x302   : > { %v427_v10 = vpop.xlane.xlu1 %426  ;;  %492 = vadd.xlane.f32.xlu0 %v1296_v8  ;;  %v451_v25 = vsub.f32 %v1277_v44, %v433_v17 }
 0x303   : > { %942 = vpow2.f32 %v464_v9  ;;  %v448_v13 = vsub.f32 %v1263_v37, %v427_v10 }
 0x304   : > { %944 = vpow2.f32 %v468_v11  ;;  %v480_v31 = vmul.f32 1.442695, %v451_v25 }
 0x305   : > { %v1299_v12 = vpop.eup %938  ;;  %v474_v19 = vmul.f32 1.442695, %v448_v13  ;;  %v437_v27 = vpop.xlane.xlu0 %436 }
 0x306   : > { %v423_v14 = vpop.xlane.xlu1 %422  ;;  %494 = vadd.xlane.f32.xlu1 %v1299_v12  ;;  %v1304_v16 = vpop.eup %940  ;;  %v453_v32 = vsub.f32 %v1275_v43, %v437_v27 }
 0x307   : > { %v446_v15 = vsub.f32 %v1265_v38, %v423_v14 }
 0x308   : > { %v484_v37 = vmul.f32 1.442695, %v453_v32 }
 0x309   : > { %v470_v18 = vmul.f32 1.442695, %v446_v15 }
 0x30a   : > { %v425_v21 = vpop.xlane.xlu1 %424  ;;  %498 = vadd.xlane.f32.xlu1 %v1304_v16 }
 0x30b   : > { %946 = vpow2.f32 %v470_v18  ;;  %v447_v22 = vsub.f32 %v1269_v40, %v425_v21 }
 0x30c   : > { %948 = vpow2.f32 %v474_v19 }
 0x30d   : > { %v1308_v23 = vpop.eup %942  ;;  %v472_v24 = vmul.f32 1.442695, %v447_v22 }
 0x30e   : > { %v429_v26 = vpop.xlane.xlu1 %428  ;;  %496 = vadd.xlane.f32.xlu0 %v1308_v23  ;;  %v1313_v29 = vpop.eup %944 }
 0x30f   : > { %950 = vpow2.f32 %v472_v24  ;;  %v449_v28 = vsub.f32 %v1267_v39, %v429_v26 }
 0x311   : > { %v476_v30 = vmul.f32 1.442695, %v449_v28 }
 0x312   : > { %v431_v33 = vpop.xlane.xlu1 %430  ;;  %500 = vadd.xlane.f32.xlu0 %v1313_v29 }
 0x313   : > { %952 = vpow2.f32 %v476_v30  ;;  %v450_v34 = vsub.f32 %v1273_v42, %v431_v33 }
 0x314   : > { %954 = vpow2.f32 %v480_v31 }
 0x315   : > { %v1318_v35 = vpop.eup %946  ;;  %v478_v36 = vmul.f32 1.442695, %v450_v34 }
 0x316   : > { %v435_v38 = vpop.xlane.xlu1 %434  ;;  %502 = vadd.xlane.f32.xlu1 %v1318_v35  ;;  %v1322_v40 = vpop.eup %948 }
 0x317   : > { %956 = vpow2.f32 %v478_v36  ;;  %v452_v39 = vsub.f32 %v1271_v41, %v435_v38 }
 0x318   : > { %958 = vpow2.f32 %v484_v37 }
 0x319   : > { %v1324_v43 = vpop.eup %950  ;;  %v482_v44 = vmul.f32 1.442695, %v452_v39 }
 0x31a   : > { %504 = vadd.xlane.f32.xlu0 %v1324_v43  ;;  %506 = vadd.xlane.f32.xlu1 %v1322_v40 }
 0x31b   : > { %960 = vpow2.f32 %v482_v44 }
 0x31d   : > { %v1330_v42 = vpop.eup %952 }
 0x31e   : > { %508 = vadd.xlane.f32.xlu0 %v1330_v42  ;;  %v1333_v41 = vpop.eup %954 }
 0x321   : > { %v1335_v46 = vpop.eup %956 }
 0x322   : > { %510 = vadd.xlane.f32.xlu1 %v1335_v46  ;;  %512 = vadd.xlane.f32.xlu0 %v1333_v41  ;;  %v1339_v47 = vpop.eup %958 }
 0x325   : > { %v1341_v48 = vpop.eup %960 }
 0x326   : > { %514 = vadd.xlane.f32.xlu1 %v1341_v48  ;;  %516 = vadd.xlane.f32.xlu0 %v1339_v47 }
 0x384   : > { %v487_v49 = vpop.xlane.xlu1 %486 }
 0x385   : > { %962 = vrcp.f32 %v487_v49 }
 0x388   : > { %v491_v50 = vpop.xlane.xlu1 %490 }
 0x38b   : > { %v489_v51 = vpop.xlane.xlu0 %488 }
 0x38c   : > { %964 = vrcp.f32 %v489_v51 }
 0x38d   : > { %966 = vrcp.f32 %v491_v50 }
 0x38f   : > { %v493_v52 = vpop.xlane.xlu0 %492  ;;  %v963_v53 = vpop.eup %962 }
 0x390   : > { %968 = vrcp.f32 %v493_v52  ;;  %v534_v56 = vmul.f32 %v963_v53, %v1287_v58  ;;  %v598_v52 = vld [vmem:[%s1434_s1] sm:$0x3] }
 0x393   : > { %v495_v54 = vpop.xlane.xlu1 %494 }
 0x394   : > { %970 = vrcp.f32 %v495_v54 }
 0x396   : > { %v965_v55 = vpop.eup %964 }
 0x397   : > { %v535_v57 = vmul.f32 %v965_v55, %v1293_v4  ;;  %v967_v59 = vpop.eup %966  ;;  %v499_v62 = vpop.xlane.xlu1 %498 }
 0x398   : > { %v536_v3 = vmul.f32 %v967_v59, %v1290_v63 }
 0x399   : > { %v550_v60 = vpack.c.bf16 %v535_v57, %v534_v56 }
 0x39a   : > { %v969_v61 = vpop.eup %968 }
 0x39b   : > { %848 = vmatpush3.bf16.msra.mxu0 %v550_v60  ;;  %v497_v0 = vpop.xlane.xlu0 %496  ;;  %v537_v5 = vmul.f32 %v969_v61, %v1296_v8 }
 0x39c   : > { %972 = vrcp.f32 %v497_v0  ;;  %849 = vmatprep.subr.bf16.mxu0 %v1094_v45 }
 0x39d   : > { %v551_v6 = vpack.c.bf16 %v537_v5, %v536_v3  ;;  %974 = vrcp.f32 %v499_v62 }
 0x39e   : > { %v971_v7 = vpop.eup %970 }
 0x39f   : > { %850 = vmatpush3.bf16.msra.mxu0 %v551_v6  ;;  %v501_v58 = vpop.xlane.xlu0 %500  ;;  %v538_v63 = vmul.f32 %v971_v7, %v1299_v12 }
 0x3a0   : > { %976 = vrcp.f32 %v501_v58  ;;  %851 = vmatprep.subr.bf16.mxu0 %v1094_v45 }
 0x3a3   : > { %v503_v4 = vpop.xlane.xlu1 %502 }
 0x3a4   : > { %978 = vrcp.f32 %v503_v4 }
 0x3a6   : > { %v973_v9 = vpop.eup %972 }
 0x3a7   : > { %v507_v10 = vpop.xlane.xlu1 %506  ;;  %v505_v11 = vpop.xlane.xlu0 %504  ;;  %v539_v8 = vmul.f32 %v973_v9, %v1308_v23 }
 0x3a8   : > { %v975_v13 = vpop.eup %974  ;;  %980 = vrcp.f32 %v505_v11 }
 0x3a9   : > { %v552_v14 = vpack.c.bf16 %v539_v8, %v538_v63  ;;  %982 = vrcp.f32 %v507_v10  ;;  %v540_v18 = vmul.f32 %v975_v13, %v1304_v16 }
 0x3aa   : > { %v977_v15 = vpop.eup %976 }
 0x3ab   : > { %852 = vmatpush3.bf16.msra.mxu0 %v552_v14  ;;  %v509_v17 = vpop.xlane.xlu0 %508  ;;  %v541_v19 = vmul.f32 %v977_v15, %v1313_v29 }
 0x3ac   : > { %984 = vrcp.f32 %v509_v17  ;;  %853 = vmatprep.subr.bf16.mxu0 %v1094_v45 }
 0x3ad   : > { %v553_v21 = vpack.c.bf16 %v541_v19, %v540_v18 }
 0x3ae   : > { %v979_v23 = vpop.eup %978 }
 0x3af   : > { %v511_v22 = vpop.xlane.xlu1 %510  ;;  %854 = vmatpush3.bf16.msra.mxu0 %v553_v21  ;;  %v513_v12 = vpop.xlane.xlu0 %512  ;;  %v542_v16 = vmul.f32 %v979_v23, %v1318_v35 }
 0x3b0   : > { %986 = vrcp.f32 %v511_v22  ;;  %855 = vmatprep.subr.bf16.mxu0 %v1094_v45 }
 0x3b1   : > { %988 = vrcp.f32 %v513_v12 }
 0x3b2   : > { %v981_v24 = vpop.eup %980 }
 0x3b3   : > { %v515_v25 = vpop.xlane.xlu1 %514  ;;  %v517_v26 = vpop.xlane.xlu0 %516  ;;  %v543_v28 = vmul.f32 %v981_v24, %v1324_v43 }
 0x3b4   : > { %v983_v27 = vpop.eup %982  ;;  %990 = vrcp.f32 %v515_v25 }
 0x3b5   : > { %992 = vrcp.f32 %v517_v26  ;;  %v554_v30 = vpack.c.bf16 %v543_v28, %v542_v16  ;;  %v544_v31 = vmul.f32 %v983_v27, %v1322_v40 }
 0x3b6   : > { %v985_v29 = vpop.eup %984 }
 0x3b7   : > { %v545_v32 = vmul.f32 %v985_v29, %v1330_v42  ;;  %856 = vmatpush3.bf16.msra.mxu0 %v554_v30 }
 0x3b8   : > { %857 = vmatprep.subr.bf16.mxu0 %v1094_v45 }
 0x3b9   : > { %v555_v33 = vpack.c.bf16 %v545_v32, %v544_v31 }
 0x3ba   : > { %v987_v34 = vpop.eup %986 }
 0x3bb   : > { %v989_v36 = vpop.eup %988  ;;  %v546_v37 = vmul.f32 %v987_v34, %v1335_v46  ;;  %858 = vmatpush3.bf16.msra.mxu0 %v555_v33 }
 0x3bc   : > { %v547_v35 = vmul.f32 %v989_v36, %v1333_v41  ;;  %859 = vmatprep.subr.bf16.mxu0 %v1094_v45 }
 0x3be   : > { %v991_v38 = vpop.eup %990  ;;  %v556_v39 = vpack.c.bf16 %v547_v35, %v546_v37 }
 0x3bf   : > { %v993_v43 = vpop.eup %992  ;;  %v548_v40 = vmul.f32 %v991_v38, %v1341_v48 }
 0x3c0   : > { %860 = vmatpush3.bf16.msra.mxu0 %v556_v39  ;;  %v549_v44 = vmul.f32 %v993_v43, %v1339_v47 }
 0x3c1   : > { %861 = vmatprep.subr.bf16.mxu0 %v1094_v45 }
 0x3c2   : > { %v557_v42 = vpack.c.bf16 %v549_v44, %v548_v40 }
 0x3c4   : > { %862 = vmatpush3.bf16.msra.mxu0 %v557_v42 }
 0x3c5   : > { %873 = vmatprep.subr.bf16.mxu0 %v1094_v45 }
 0x3c7   : > { %864 = vmatmul.mubr.bf16.vlgmr.msra.gmra.mrb[4].mxu0 %v1253_v20 }
 0x3c8   : > { %875 = vmatprep.mubr.msk.bf16.mxu0 %vm1095_vm3, %v1094_v45 }
 0x49a   : > { %v592_v41 = vpop.f32.mrb[4].mxu0 }
 0x49b   : > { %v599_v46 = vpack.c.bf16 %v592_v41, %v592_v41  ;;  %v865_v49 = vpop.f32.mrb[5].mxu0 }
 0x49c   : > { %v595_v48 = vpop.f32.mrb[6].mxu0 }
 0x49d   : > { %v605_v50 = vsel %vm251_vm2, %v599_v46, 0  ;;  %v648_v47 = vrot.slane %v599_v46, 1  ;;  %v866_v51 = vpop.f32.mrb[7].mxu0 }
 0x49e   : > { %868 = vmatpush3.bf16.msra.mxu1 %v605_v50 }
 0x49f   : > { %v650_v20 = vsel %vm251_vm2, %v648_v47, 0 }
 0x4a0   : > { %874 = vmatpush3.bf16.msra.mxu0 %v650_v20 }
 0x4a1   : > { %870 = vmatmul.mubr.msk.bf16.vlgmr.msra.gmra.mrb[16].mxu1 %vm600_vm4, %v598_v52 }
 0x4a3   : > { %876 = vmatmul.mubr.msk.bf16.vlgmr.msra.gmra.mrb[8].mxu0 %vm600_vm4, %v598_v52 }
 0x574   : > { %v641_v45 = vpop.f32.mrb[16].mxu1 }
 0x575   : > { %v642_v53 = vadd.f32 %v641_v45, %v1232_v1  ;;  %v871_v54 = vpop.f32.mrb[17].mxu1 }
 0x576   : > { %v686_v55 = vpop.f32.mrb[8].mxu0  ;;  %v644_v56 = vpop.f32.mrb[18].mxu1 }
 0x577   : > { %692 = vst [vmem:[%s186_s10] sm:$0xf] %v642_v53  ;;  %v687_v57 = vadd.f32 %v686_v55, %v1236_v2  ;;  %v877_v59 = vpop.f32.mrb[9].mxu0  ;;  %v872_v60 = vpop.f32.mrb[19].mxu1 }
 0x578   : > { %v689_v1 = vpop.f32.mrb[10].mxu0 }
 0x579   : > { %693 = vst [vmem:[%s186_s10 + $0x4] sm:$0xf] %v687_v57  ;;  %v878_v61 = vpop.f32.mrb[11].mxu0 }
 0x57a   : > { %1037 = shalt.err (!%p1034_p4)
}
 0x57b   : > { %s1038_s29 = scalar_lea.hbm %s1389_s20, 128  ;;  %s1042_s7 = scalar_lea.hbm %s1436_s3, 256 }
 0x57c   : > { %p1039_p5 = scmp.ne.s32.totalorder %s1389_s20, %s1038_s29  ;;  %p1043_p0 = scmp.lt.u32.totalorder %s1389_s20, %s1436_s3 }
 0x57d   : > { %p1044_p1 = scmp.lt.u32.totalorder %s1042_s7, %s1038_s29  ;;  %p1046_p6 = scmp.lt.u32.totalorder %s1038_s29, %s1389_s20 }
 0x57e   : > { %p1040_p8 = pnand %p1039_p5, %p1445_p11 }
 0x57f   : > { %p1045_p3 = por %p1044_p1, %p1043_p0 }
 0x580   : > { %p1041_p9 = pneg %p1040_p8 }
 0x581   : > { %p1047_p12 = por %p1046_p6, %p1045_p3 }
 0x583   : > { %p1048_p13 = pnand %p1047_p12, %p1041_p9 }
 0x585   : > { %1051 = shalt.err (!%p1048_p13)
}
 0x586   : > { %882 = dma.vmem_to_hbm [thread:$0]  (%p1445_p11), %s1391_s11, 128, %s1389_s20, %s695_s16  }
 0x587 PF: > { %s721_s6 = sand.u32 1, %s1078_s12   ;;  %p1446_p7 = scmp.ne.s32.totalorder %s1441_s25, 0 }
 0x588   : > { %p1447_p10 = scmp.ge.s32.totalorder %s1090_s15, 2  ;;  %s722_s8 = scalar_lea.sflag [#allocation4], %s721_s6 }
 0x58a   : > { %p889_p2 = pnand %p1447_p10, %p1446_p7 }
 0x58c   : > { %1073 = dma.done.wait (!%p889_p2), %s722_s8, 128  }
 0x58d   : > { %1075 = vsyncadd (!%p889_p2), %s722_s8, 4294967168  ;;  %p16_p4 = scmp.ge.s32.totalorder %s1142_s18, 4   ;;  %s1448_s12 = smov %s1082_s13 }
 0x58e   : > { %s1449_s13 = smov %s1086_s14  ;;  %s1450_s14 = smov %s1154_s21 }
 0x58f   : > { %s1451_s15 = smov %s1142_s18  ;;  %18 = sbr.rel (!%p16_p4) target bundleno = 5 (0x5), region = 77 }
 0x596   :  { %727 = vsyncpa [#allocation3], 1 }
 0x597   :  { %729 = vsyncpa [#allocation3 + $0x1], 1 }
 0x598   :  { %730 = vsyncpa [#allocation4], 1 }
 0x599   :  { %732 = vsyncpa [#allocation4 + $0x1], 1 }

</bundles_post_ra>
